<compile_context>
chip_gen: v6e
topology: v6e:2x2x1
jax: 0.10.0
libtpu: 0.0.40
codegen_flags: <defaults>
</compile_context>

<pallas_src>
import functools
import math

import jax
import jax.numpy as jnp
from jax import lax
from jax.experimental import pallas as pl
from jax.experimental.pallas import tpu as pltpu


def _round_up(x, n):
    return ((x + n - 1) // n) * n


# ---------------------------------------------------------------------------
# Per-generation budgets / tunables
# ---------------------------------------------------------------------------
_VMEM_LIMIT_BYTES = 40 * 1024 * 1024   # < v7x's 64 MiB physical, << v5e/v6e's 128 MiB
_OUT_BLOCK_BYTES = 4 * 1024 * 1024     # cap one output tile (x2 pipelined = 8 MiB)
_FAST_TABLE_BYTES = 4 * 1024 * 1024    # VMEM-resident-table fast-path threshold
_FAST_MAX_VOCAB = 2048                 # keeps the (tile, vocab) one-hot + MXU work small
_SMEM_IDX_TOKENS = 32 * 1024           # <=128 KiB of int32 ids prefetched per call


# ---------------------------------------------------------------------------
# Kernels
# ---------------------------------------------------------------------------
def _embed_onehot_kernel(ids_ref, tab_ref, o_ref, *, vocab, scale):
    """Fast path: table resident in VMEM, gather via one-hot matmul on the MXU.

    ids_ref : VMEM (tile, 1) int32 token ids for this tile
    tab_ref : VMEM (vocab, d_model) table (constant index_map -> loaded once)
    o_ref   : VMEM (tile, d_model) output tile (lane-dense: full d_model)
    """
    ids = ids_ref[...]                                              # (tile, 1)
    hot = ids == lax.broadcasted_iota(jnp.int32, (ids.shape[0], vocab), 1)
    acc = jnp.dot(hot.astype(tab_ref.dtype), tab_ref[...],
                  preferred_element_type=jnp.float32)               # (tile, d_model)
    o_ref[...] = (acc * scale).astype(o_ref.dtype)


def _embed_hbm_kernel(ids_ref, tab_ref, o_ref, sem, *, tile_m, scale):
    """General path: gather one tile of rows straight from the HBM table.

    ids_ref : SMEM int32 token ids (scalar prefetch, chunked in the wrapper)
    tab_ref : HBM (vocab, d_model) table (memory_space=pl.ANY, manual DMA)
    o_ref   : VMEM (tile_m, d_model) output tile -- DMA destination directly
              (no separate gather scratch buffer)
    sem     : single DMA semaphore shared by all row copies of this tile
    """
    base = pl.program_id(0) * tile_m

    # Issue ALL row DMAs before any wait.  Every SMEM id read happens before
    # the wait (keeps sst->sld forwarding intact), and the manual 8-way unroll
    # gives the scheduler 8 descriptor builds per loop iteration with no
    # per-row branch overhead.
    def issue8(t8, carry):
        t0 = t8 * 8
        for u in range(8):                                  # static unroll
            t = t0 + u
            row = ids_ref[base + t]
            pltpu.make_async_copy(
                tab_ref.at[pl.ds(row, 1), :],
                o_ref.at[pl.ds(t, 1), :],
                sem,
            ).start()
        return carry

    lax.fori_loop(0, tile_m // 8, issue8, 0)

    # ONE wait retires every row copy of this tile: the DMA semaphore counts
    # bytes, and this descriptor's destination (the whole tile) covers exactly
    # the tile_m * d_model elements the row copies signalled.
    pltpu.make_async_copy(o_ref, o_ref, sem).wait()

    # Scale in place in the table's native dtype (bf16 stays bf16 on v6e/v7x).
    o_ref[...] = o_ref[...] * jnp.asarray(scale, dtype=o_ref.dtype)


# ---------------------------------------------------------------------------
# pallas_call wrappers
# ---------------------------------------------------------------------------
def _call_onehot(flat_ids, table, *, tile, scale):
    vocab, d_model = table.shape
    n = flat_ids.shape[0]
    itemsize = jnp.dtype(table.dtype).itemsize
    kernel = functools.partial(_embed_onehot_kernel, vocab=vocab, scale=scale)
    return pl.pallas_call(
        kernel,
        out_shape=jax.ShapeDtypeStruct((n, d_model), table.dtype),
        grid_spec=pltpu.PrefetchScalarGridSpec(
            num_scalar_prefetch=0,
            grid=(n // tile,),
            in_specs=[
                pl.BlockSpec((tile, 1), lambda i: (i, 0)),          # token ids (VMEM)
                pl.BlockSpec((vocab, d_model), lambda i: (0, 0)),   # table resident in VMEM
            ],
            out_specs=pl.BlockSpec((tile, d_model), lambda i: (i, 0)),
        ),
        compiler_params=pltpu.CompilerParams(
            dimension_semantics=("parallel",),
            vmem_limit_bytes=_VMEM_LIMIT_BYTES),
        cost_estimate=pl.CostEstimate(
            flops=2 * n * vocab * d_model,
            transcendentals=0,
            bytes_accessed=vocab * d_model * itemsize
                           + n * 4 + n * d_model * itemsize),
    )(flat_ids.reshape(n, 1), table)


def _call_hbm(flat_ids, table, *, tile, scale):
    vocab, d_model = table.shape
    n = flat_ids.shape[0]
    itemsize = jnp.dtype(table.dtype).itemsize
    kernel = functools.partial(_embed_hbm_kernel, tile_m=tile, scale=scale)
    return pl.pallas_call(
        kernel,
        out_shape=jax.ShapeDtypeStruct((n, d_model), table.dtype),
        grid_spec=pltpu.PrefetchScalarGridSpec(
            num_scalar_prefetch=1,                                  # ids -> SMEM
            grid=(n // tile,),
            in_specs=[pl.BlockSpec(memory_space=pl.ANY)],           # table stays in HBM
            out_specs=pl.BlockSpec((tile, d_model), lambda i, ids: (i, 0)),
            scratch_shapes=[pltpu.SemaphoreType.DMA],
        ),
        compiler_params=pltpu.CompilerParams(
            dimension_semantics=("parallel",),
            vmem_limit_bytes=_VMEM_LIMIT_BYTES),
        cost_estimate=pl.CostEstimate(
            flops=n * d_model,
            transcendentals=0,
            bytes_accessed=n * 4 + 2 * n * d_model * itemsize),
    )(flat_ids, table)


# ---------------------------------------------------------------------------
# Public entry point
# ---------------------------------------------------------------------------
@functools.partial(jax.jit, static_argnames=("tile_m", "force_hbm"))
def embeddings(x, table, *, tile_m=256, force_hbm=False):
    """x: int token ids [...] -> [..., d_model] = table[x] * sqrt(d_model)."""
    vocab, d_model = table.shape
    orig_shape = x.shape
    m = int(math.prod(orig_shape))
    scale = math.sqrt(d_model)
    itemsize = jnp.dtype(table.dtype).itemsize

    # VMEM budgeting uses (8, 128)-padded layouts.
    row_bytes = _round_up(d_model, 128) * itemsize
    table_vmem_bytes = _round_up(vocab, 8) * row_bytes

    # Tile of token rows: multiple of 8 sublanes, large (amortizes the ~0.35us
    # per-grid-step overhead and keeps many row DMAs in flight), but capped so
    # (a) the double-buffered output block fits every generation's budget and
    # (b) there are >=2 grid steps whenever possible (both v7x cores get work).
    tile = min(tile_m, max(8, _round_up(-(-m // 2), 8)))
    tile = min(tile, max(8, (_OUT_BLOCK_BYTES // row_bytes) // 8 * 8))
    tile = max(8, (tile // 8) * 8)
    m_pad = _round_up(m, tile)

    # Clamp ids (an out-of-range token would otherwise be an out-of-bounds HBM
    # DMA) and pad to a whole number of tiles with row 0 (sliced off below).
    flat_ids = jnp.clip(x.reshape(m).astype(jnp.int32), 0, vocab - 1)
    if m_pad != m:
        flat_ids = jnp.pad(flat_ids, (0, m_pad - m))

    use_fast = (not force_hbm
                and vocab <= _FAST_MAX_VOCAB
                and table_vmem_bytes <= _FAST_TABLE_BYTES)

    if use_fast:
        out = _call_onehot(flat_ids, table, tile=tile, scale=scale)
    else:
        # HBM gather path, chunked so each pallas_call scalar-prefetches at
        # most _SMEM_IDX_TOKENS ids into SMEM (scales to arbitrary batch*seq).
        per_call = max(tile, (_SMEM_IDX_TOKENS // tile) * tile)
        pieces = []
        for start in range(0, m_pad, per_call):
            stop = min(start + per_call, m_pad)
            pieces.append(_call_hbm(flat_ids[start:stop], table,
                                    tile=tile, scale=scale))
        out = pieces[0] if len(pieces) == 1 else jnp.concatenate(pieces, axis=0)

    if m_pad != m:
        out = out[:m]
    return out.reshape(*orig_shape, d_model)


def _reference(x, table):
    return jnp.take(table, x, axis=0) * math.sqrt(table.shape[1])


if __name__ == "__main__":
    key = jax.random.PRNGKey(0)
    k1, k2, k3 = jax.random.split(key, 3)

    # Shapes consistent with the module: token ids [batch, seq], table [vocab, d_model].
    batch, seq, d_model, vocab = 2, 8, 32, 97
    idx = jax.random.randint(k1, (batch, seq), 0, vocab, dtype=jnp.int32)
    table = jax.random.normal(k2, (vocab, d_model), dtype=jnp.float32)
    ref = _reference(idx, table)

    # Fast path (table resident in VMEM, MXU one-hot gather).
    out_fast = jax.block_until_ready(embeddings(idx, table))
    assert out_fast.shape == (batch, seq, d_model)
    # MXU f32 matmul may run reduced-precision passes -> modest tolerance.
    assert jnp.allclose(out_fast, ref, rtol=2e-2, atol=1e-2), "fast path mismatch"

    # HBM DMA-gather path (used automatically for large vocab tables).
    out_hbm = jax.block_until_ready(embeddings(idx, table, force_hbm=True))
    assert jnp.allclose(out_hbm, ref, rtol=1e-5, atol=1e-5), "hbm path mismatch"

    # Second shape exercising padding (m not a multiple of the tile) on both paths.
    idx2 = jax.random.randint(k3, (3, 67), 0, vocab, dtype=jnp.int32)
    ref2 = _reference(idx2, table)
    out2_fast = jax.block_until_ready(embeddings(idx2, table))
    out2_hbm = jax.block_until_ready(embeddings(idx2, table, force_hbm=True))
    assert jnp.allclose(out2_fast, ref2, rtol=2e-2, atol=1e-2), "fast path (padded) mismatch"
    assert jnp.allclose(out2_hbm, ref2, rtol=1e-5, atol=1e-5), "hbm path (padded) mismatch"

    print("KERNEL_OK")
</pallas_src>

<mosaic_0001>
module attributes {stable_mosaic.version = 11 : i64} {
  func.func @_embed_onehot_kernel(%arg0: i32, %arg1: memref<8x1xi32, #tpu.memory_space<vmem>>, %arg2: memref<97x32xf32, #tpu.memory_space<vmem>>, %arg3: memref<8x32xf32, #tpu.memory_space<vmem>>) attributes {dimension_semantics = [#tpu.dimension_semantics<parallel>], iteration_bounds = array<i64: 2>, scalar_prefetch = 0 : i64, scratch_operands = 0 : i64, tpu.core_type = #tpu.core_type<tc>, window_params = [{transform_indices = @transform_0, window_bounds = array<i64: 8, 1>}, {pipeline_mode = #tpu.pipeline_mode<synchronous>, transform_indices = @transform_1, window_bounds = array<i64: 97, 32>}, {transform_indices = @transform_2, window_bounds = array<i64: 8, 32>}]} {
    %c0 = arith.constant 0 : index
    %c0_0 = arith.constant 0 : index
    %0 = vector.load %arg1[%c0, %c0_0] : memref<8x1xi32, #tpu.memory_space<vmem>>, vector<8x1xi32>
    %1 = tpu.iota {dimensions = array<i32: 1>} : vector<8x97xi32>
    %2 = vector.broadcast %0 : vector<8x1xi32> to vector<8x97xi32>
    %3 = arith.cmpi eq, %2, %1 : vector<8x97xi32>
    %4 = arith.extui %3 : vector<8x97xi1> to vector<8x97xi32>
    %5 = arith.sitofp %4 : vector<8x97xi32> to vector<8x97xf32>
    %c0_1 = arith.constant 0 : index
    %c0_2 = arith.constant 0 : index
    %6 = vector.load %arg2[%c0_1, %c0_2] : memref<97x32xf32, #tpu.memory_space<vmem>>, vector<97x32xf32>
    %cst = arith.constant dense<0.000000e+00> : vector<8x32xf32>
    %7 = tpu.matmul %5, %6, %cst {dimension_numbers = #tpu.dot_dimension_numbers<[1], [0], [0], [1], [0, 0, 1, 1], [], []>} : vector<8x97xf32>, vector<97x32xf32>, vector<8x32xf32> -> vector<8x32xf32>
    %cst_3 = arith.constant 5.65685415 : f32
    %8 = vector.broadcast %cst_3 : f32 to vector<8x32xf32>
    %9 = arith.mulf %7, %8 : vector<8x32xf32>
    %c0_4 = arith.constant 0 : index
    %c0_5 = arith.constant 0 : index
    %10 = vector.load %arg3[%c0_4, %c0_5] : memref<8x32xf32, #tpu.memory_space<vmem>>, vector<8x32xf32>
    tpu.vector_store %arg3[%c0_4, %c0_5], %9 {strides = array<i32>} : memref<8x32xf32, #tpu.memory_space<vmem>>, vector<8x32xf32>,
    return
  }
  func.func @transform_0(%arg0: i32) -> (i32, i32) {
    %c0_i32 = arith.constant 0 : i32
    %c0_i32_0 = arith.constant 0 : i32
    return %arg0, %c0_i32 : i32, i32
  }
  func.func @transform_1(%arg0: i32) -> (i32, i32) {
    %c0_i32 = arith.constant 0 : i32
    %c0_i32_0 = arith.constant 0 : i32
    %c0_i32_1 = arith.constant 0 : i32
    return %c0_i32, %c0_i32_0 : i32, i32
  }
  func.func @transform_2(%arg0: i32) -> (i32, i32) {
    %c0_i32 = arith.constant 0 : i32
    %c0_i32_0 = arith.constant 0 : i32
    return %arg0, %c0_i32 : i32, i32
  }
}

</mosaic_0001>

<bundles_post_ra>
// kernel: embeddings.1
= control target key start
LH: loop header
LB: loop body
LE: loop exit
PB: predicated region body
PF: predicated region fallthrough
CT: control target
= control target key end

     0   :  { %7 = vsyncpa [#allocation3], 0  ;;  %s627_s0 = inlined_call_operand.vmem [shape: s32[16,1], index: 0, kind: input, shape index: {}]   ;;  %s628_s1 = inlined_call_operand.vmem [shape: f32[97,32], index: 1, kind: input, shape index: {}]   ;;  %s629_s2 = inlined_call_operand.hbm [shape: f32[16,32], index: 2, kind: output, shape index: {}]  }
   0x1   :  { %9 = vsyncpa [#allocation3 + $0x1], 0  ;;  %s495_s9 = smov 0   ;;  %s497_s10 = smov 0  }
   0x2   :  { %s499_s11 = smov 0   ;;  %s501_s12 = smov 0  }
   0x3 LB: > { %s516_s13 = sadd.s32 4294967295, %s474_s12   ;;  %s315_s14 = sadd.s32 4294967294, %s474_s12   ;;  %s474_s12 = sphi %s501_s12, %s635_s12   ;;  %s470_s11 = sphi %s499_s11, %s634_s11   ;;  %s466_s10 = sphi %s497_s10, %s633_s10   ;;  %s462_s9 = sphi %s495_s9, %s632_s9  }
   0x4   : > { %s520_s15 = sadd.s32 1, %s474_s12   ;;  %s69_s16 = sadd.s32 1, %s470_s11 }
   0x5   : > { %s66_s17 = ssub.s32 %s474_s12, %s520_s15  ;;  %p79_p0 = scmp.ne.s32.totalorder %s470_s11, %s466_s10 }
   0x6   : > { %p67_p1 = scmp.eq.s32.totalorder %s66_s17, 0  ;;  %p80_p2 = scmp.eq.s32.totalorder %s516_s13, 1 }
   0x7   : > { %p85_p3 = scmp.ne.s32.totalorder %s466_s10, %s462_s9  ;;  %p86_p4 = scmp.eq.s32.totalorder %s315_s14, 1 }
   0x8   : > { %s531_s18 = scalar_select %p67_p1, %s470_s11, %s69_s16  }
   0x9   : > { %p533_p5 = por %p80_p2, %p79_p0  ;;  %p537_p6 = por %p86_p4, %p85_p3 }
   0xa   : > { %p318_p7 = scmp.ge.s32.totalorder %s474_s12, 1  ;;  %p114_p8 = scmp.lt.s32.totalorder %s474_s12, 3 }
   0xc   : > { %p115_p9 = pnand %p318_p7, %p114_p8 }
   0xd   : > { %p135_p10 = scmp.lt.s32.totalorder (!%p115_p9), %s516_s13, 1  ;;  %s132_s5 = sand.u32 (!%p115_p9), 1, %s466_s10  }
   0xe   : > { %118 = sbr.rel (%p115_p9) target bundleno = 359 (0x167), region = 28  ;;  %s319_s6 = sshll.u32 (!%p115_p9), %s132_s5, 3 }
   0xf   : > { %s325_s7 = sshll.u32 (!%p115_p9), %s516_s13, 7  ;;  %s134_s8 = scalar_lea.vmem (!%p115_p9), [#allocation2], %s319_s6 }
  0x10   : > { %s256_s14 = sshll.u32 (!%p115_p9), %s134_s8, 4  ;;  %s592_s21 = scalar_lea.hbm (!%p115_p9), %s629_s2, %s325_s7  ;;  %s257_s14 = int_to_ptr.vmem [resolvable:$true] %s256_s14 }
  0x11   : > { %s243_s22 = scalar_lea.sflag (!%p115_p9), [#allocation3], %s132_s5  ;;  %s414_s23 = scalar_lea.vmem (!%p115_p9), %s257_s14, 128 }
  0x12   : > { %p415_p11 = scmp.ne.s32.totalorder (!%p115_p9), %s257_s14, %s414_s23 }
  0x13   : > { %v160_v0 = vld [vmem:[%s628_s1 + $0x60] sm:$0x1]  ;;  %vm165_vm0 = vcmask 1040384   ;;  %v476_v1 = vmov 0   ;;  %v477_v2 = vmov 0.0   ;;  %v159_v3 = vld [vmem:[%s628_s1 + $0x58] sm:$0xff]  ;;  %v140_v16 = vlaneseq }
  0x14   : > { %413 = vset.pattern.permute.xlu0 %v476_v1  ;;  %342 = vmatprep.subr.mxu0 %v477_v2  ;;  %s136_s25 = scalar_select %p135_p10, %s516_s13, 1  ;;  %v158_v4 = vld [vmem:[%s628_s1 + $0x50] sm:$0xff]  ;;  %vm478_vm1 = vmmov 0   ;;  %v157_v5 = vld [vmem:[%s628_s1 + $0x48] sm:$0xff]  ;;  %v156_v7 = vld [vmem:[%s628_s1 + $0x40] sm:$0xff]  ;;  %vm161_vm2 = vcmask 793600  }
  0x15   : > { %343 = vmatpush3.msk.msra.mxu0 %vm165_vm0, %v160_v0  ;;  %368 = vmatprep.mubr.msk.f32.mxu0 %vm478_vm1, %v477_v2  ;;  %v155_v8 = vld [vmem:[%s628_s1 + $0x38] sm:$0xff]  ;;  %v154_v9 = vld [vmem:[%s628_s1 + $0x30] sm:$0xff]  ;;  %v153_v10 = vld [vmem:[%s628_s1 + $0x28] sm:$0xff]  ;;  %v141_v17 = vand.u32 127, %v140_v16  ;;  %vm240_vm4 = vcmask 261120   ;;  %p416_p12 = pnand %p415_p11, %p533_p5  ;;  %s479_s13 = smov [#allocation2]  }
  0x16   : > { %344 = vmatprep.subr.mxu0 %v477_v2  ;;  %s320_s28 = sshll.u32 %s136_s25, 3  ;;  %v152_v11 = vld [vmem:[%s628_s1 + $0x20] sm:$0xff]  ;;  %v151_v12 = vld [vmem:[%s628_s1 + $0x18] sm:$0xff]  ;;  %v150_v13 = vld [vmem:[%s628_s1 + $0x10] sm:$0xff]  ;;  %s418_s24 = sshll.u32 %s479_s13, 4  ;;  %s419_s24 = int_to_ptr.vmem [resolvable:$false] %s418_s24 }
  0x17   : > { %345 = vmatpush3.msra.mxu0 %v159_v3  ;;  %s138_s3 = scalar_lea.vmem %s627_s0, %s320_s28  ;;  %v149_v14 = vld [vmem:[%s628_s1 + $0x8] sm:$0xff]  ;;  %v148_v15 = vld [vmem:[%s628_s1] sm:$0xff]  ;;  %p417_p13 = pneg %p416_p12 }
  0x18   : > { %346 = vmatprep.subr.mxu0 %v477_v2  ;;  %v139_v6 = vld [vmem:[%s138_s3] sm:$0xff]  ;;  %s420_s25 = scalar_lea.vmem %s419_s24, 256  ;;  %p421_p0 = scmp.lt.s32.totalorder %s257_s14, %s419_s24 }
  0x19   : > { %347 = vmatpush3.msra.mxu0 %v158_v4  ;;  %143 = vperm.xlu0 %413, %v139_v6   ;;  %p422_p1 = scmp.lt.s32.totalorder %s420_s25, %s414_s23 }
  0x1a   : > { %348 = vmatprep.subr.mxu0 %v477_v2 }
  0x1b   : > { %349 = vmatpush3.msra.mxu0 %v157_v5  ;;  %p423_p2 = por %p422_p1, %p421_p0 }
  0x1c   : > { %350 = vmatprep.subr.mxu0 %v477_v2 }
  0x1d   : > { %351 = vmatpush3.msra.mxu0 %v156_v7  ;;  %p424_p3 = pnand %p423_p2, %p417_p13 }
  0x1e   : > { %352 = vmatprep.subr.mxu0 %v477_v2 }
  0x1f   : > { %353 = vmatpush3.msra.mxu0 %v155_v8 }
  0x20   : > { %354 = vmatprep.subr.mxu0 %v477_v2 }
  0x21   : > { %355 = vmatpush3.msra.mxu0 %v154_v9 }
  0x22   : > { %356 = vmatprep.subr.mxu0 %v477_v2 }
  0x23   : > { %357 = vmatpush3.msra.mxu0 %v153_v10 }
  0x24   : > { %358 = vmatprep.subr.mxu0 %v477_v2 }
  0x25   : > { %359 = vmatpush3.msra.mxu0 %v152_v11 }
  0x26   : > { %360 = vmatprep.subr.mxu0 %v477_v2 }
  0x27   : > { %361 = vmatpush3.msra.mxu0 %v151_v12 }
  0x28   : > { %362 = vmatprep.subr.mxu0 %v477_v2 }
  0x29   : > { %363 = vmatpush3.msra.mxu0 %v150_v13 }
  0x2a   : > { %364 = vmatprep.subr.mxu0 %v477_v2 }
  0x2b   : > { %365 = vmatpush3.msra.mxu0 %v149_v14 }
  0x2c   : > { %366 = vmatprep.subr.mxu0 %v477_v2 }
  0x2d   : > { %367 = vmatpush3.msra.mxu0 %v148_v15 }
  0x94   : > { %v144_v18 = vpop.permute.xlu0 %143 }
  0x95   : > { %vm145_vm3 = vcmp.eq.s32.totalorder %v144_v18, %v141_v17 }
  0x96   : > { %v321_v19 = vsel %vm145_vm3, 1.0, %v477_v2 }
  0x97   : > { %369 = vmatmul.mubr.msk.f32.vlgmr.msra.gmra.mxu0 %vm161_vm2, %v321_v19 }
 0x157   : > { %v235_v20 = vpop.f32.mrf.mxu0 }
 0x158   : > { %v239_v21 = vmul.f32 5.656854, %v235_v20 }
 0x159   : > { %v370_v22 = vpop.f32.mrf.mxu0 }
 0x15a   : > { %241 = vst.msk [vmem:[%s134_s8] sm:$0xff] %vm240_vm4, %v239_v21 }
 0x15b   : > { %427 = shalt.err (!%p424_p3)
}
 0x15c   : > { %s428_s26 = scalar_lea.hbm %s592_s21, 128  ;;  %s432_s29 = scalar_lea.hbm %s629_s2, 256 }
 0x15d   : > { %p429_p4 = scmp.ne.s32.totalorder %s592_s21, %s428_s26  ;;  %p433_p9 = scmp.lt.s32.totalorder %s592_s21, %s629_s2 }
 0x15e   : > { %p434_p10 = scmp.lt.s32.totalorder %s432_s29, %s428_s26 }
 0x15f   : > { %p430_p7 = pnand %p429_p4, %p533_p5 }
 0x160   : > { %p435_p11 = por %p434_p10, %p433_p9 }
 0x161   : > { %p431_p8 = pneg %p430_p7 }
 0x163   : > { %p436_p12 = pnand %p435_p11, %p431_p8 }
 0x165   : > { %439 = shalt.err (!%p436_p12)
}
 0x166   : > { %371 = dma.vmem_to_hbm [thread:$0]  (%p533_p5), %s257_s14, 128, %s592_s21, %s243_s22  }
 0x167 PF: > { %p377_p13 = scmp.ge.s32.totalorder %s474_s12, 2  ;;  %s268_s4 = sand.u32 1, %s462_s9  }
 0x168   : > { %s269_s5 = scalar_lea.sflag [#allocation3], %s268_s4 }
 0x169   : > { %p374_p0 = pnand %p377_p13, %p537_p6 }
 0x16b   : > { %p375_p1 = pneg %p374_p0 }
 0x16d   : > { %457 = dma.done.wait (%p375_p1), %s269_s5, 128  }
 0x16e   : > { %459 = vsyncadd (%p375_p1), %s269_s5, 4294967168  ;;  %p12_p2 = scmp.ge.s32.totalorder %s520_s15, 4   ;;  %s632_s9 = smov %s466_s10 }
 0x16f   : > { %s633_s10 = smov %s470_s11  ;;  %s634_s11 = smov %s531_s18 }
 0x170   : > { %s635_s12 = smov %s520_s15  ;;  %14 = sbr.rel (!%p12_p2) target bundleno = 3 (0x3), region = 63 }
 0x175   :  { %274 = vsyncpa [#allocation3], 1 }
 0x176   :  { %276 = vsyncpa [#allocation3 + $0x1], 1 }

</bundles_post_ra>
